<compile_context>
chip_gen: v5e
topology: v5e:2x2
jax: 0.10.0
libtpu: 0.0.40
codegen_flags: <defaults>
</compile_context>

<pallas_src>
import jax
import jax.numpy as jnp
from jax import lax
from jax.experimental import pallas as pl
from jax.experimental.pallas import tpu as pltpu

LANE = 128
SUBLANE = 8


# ------------------------------ helpers ------------------------------------- #

def _round_up(x, m):
    return ((x + m - 1) // m) * m


def _cdiv(a, b):
    return -(-a // b)


def _chip_defaults():
    """(tile_rows, n_parallel, vmem_limit_bytes) per TPU generation.

    v7x: 2 TCs share ~3.2 TB/s HBM -> biggest tiles + both cores, stay well under the
         64 MiB/TC physical VMEM.
    v5e: single TC, 16 MiB default scoped VMEM -> cap tiles, raise the limit modestly.
    v6e / other single-TC chips: 4096-row tiles (2 MiB/input/step), generous limit
         (128 MiB physical VMEM).
    """
    try:
        kind = jax.devices()[0].device_kind.lower()
    except Exception:  # non-TPU / interpret fallback
        kind = ""
    if "v7" in kind:
        return 8192, 2, 48 * 1024 * 1024
    if "v5" in kind:
        return 2048, 1, 32 * 1024 * 1024
    return 4096, 1, 64 * 1024 * 1024


def _to_slab(x):
    """Flatten to a lane-dense (rows, 128) slab; rows >= 8.

    Common case (size % 128 == 0 and size >= 1024): a pure reshape, no pad, no copy.
    Ragged-lane / tiny-array case: pad with zeros (zeros contribute exactly 0 to both
    the |img-rec| sum and the KL sum).  Row-direction raggedness (rows % tile_rows != 0)
    is handled with an in-kernel mask on the last block, so padding never scales with
    the tile size or the number of parallel slices.
    """
    flat = jnp.ravel(x)
    n = flat.size
    rows = max(_cdiv(n, LANE), SUBLANE)
    if rows * LANE != n:
        flat = jnp.pad(flat, (0, rows * LANE - n))
    return flat.reshape(rows, LANE), rows


def _pick_tile(rows, tile_rows):
    """Largest multiple of 8 that is <= rows and <= tile_rows (keeps block <= array)."""
    t = min(int(tile_rows), (rows // SUBLANE) * SUBLANE)
    t = (t // SUBLANE) * SUBLANE
    return max(SUBLANE, t)


# ------------------------------ kernels ------------------------------------- #

def _make_absdiff_kernel(blocks_per_par, tile_rows, rows_valid, needs_mask):
    """sum |img - rec| folded into a resident (8,128) f32 accumulator per parallel slice."""

    def kernel(img_ref, rec_ref, acc_ref):
        i = pl.program_id(1)

        @pl.when(i == 0)
        def _():
            acc_ref[...] = jnp.zeros_like(acc_ref)

        diff = jnp.abs(img_ref[...].astype(jnp.float32)
                       - rec_ref[...].astype(jnp.float32))
        if needs_mask:
            # Mask rows beyond the valid slab extent (ragged last block and any
            # clamped / replicated out-of-range block of this parallel slice).
            start = (pl.program_id(0) * blocks_per_par + i) * tile_rows
            row = start + lax.broadcasted_iota(jnp.int32, diff.shape, 0)
            diff = jnp.where(row < rows_valid, diff, 0.0)
        # Pure-VPU fold of 8-row groups; the single cross-lane reduce happens in the
        # wrapper on the tiny (n_parallel, 8, 128) partials.
        acc_ref[...] += jnp.sum(diff.reshape(-1, SUBLANE, LANE), axis=0)

    return kernel


def _make_kl_kernel(tile_rows, rows_valid, needs_mask):
    """sum 0.5*(mean^2 + exp(logvar) - 1 - logvar) into a resident (8,128) accumulator."""

    def kernel(mean_ref, lv_ref, acc_ref):
        i = pl.program_id(0)

        @pl.when(i == 0)
        def _():
            acc_ref[...] = jnp.zeros_like(acc_ref)

        m = mean_ref[...].astype(jnp.float32)
        lv = lv_ref[...].astype(jnp.float32)
        kl = 0.5 * (m * m + jnp.exp(lv) - 1.0 - lv)
        if needs_mask:
            row = i * tile_rows + lax.broadcasted_iota(jnp.int32, kl.shape, 0)
            kl = jnp.where(row < rows_valid, kl, 0.0)
        acc_ref[...] += jnp.sum(kl.reshape(-1, SUBLANE, LANE), axis=0)

    return kernel


# ------------------------------ pallas wrappers ------------------------------ #

def _abs_diff_sum(images, reconstructions, tile_rows, n_parallel, vmem_limit):
    """sum |images - reconstructions| over all elements (f32)."""
    img, rows = _to_slab(images)
    rec, _ = _to_slab(reconstructions)

    t = _pick_tile(rows, tile_rows)
    blocks_total = _cdiv(rows, t)
    n_parallel = max(1, min(int(n_parallel), blocks_total))
    bpp = _cdiv(blocks_total, n_parallel)
    needs_mask = (n_parallel * bpp * t != rows)

    def in_map(p, i):
        # Clamp out-of-range (p, i) pairs to the last real block; their contribution is
        # fully masked in the kernel, so this only costs (n_parallel - 1) extra blocks
        # of DMA at most.
        return (jnp.minimum(p * bpp + i, blocks_total - 1), 0)

    parts = pl.pallas_call(
        _make_absdiff_kernel(bpp, t, rows, needs_mask),
        out_shape=jax.ShapeDtypeStruct((n_parallel, SUBLANE, LANE), jnp.float32),
        grid_spec=pltpu.PrefetchScalarGridSpec(
            num_scalar_prefetch=0,
            grid=(n_parallel, bpp),
            in_specs=[
                pl.BlockSpec((t, LANE), in_map),
                pl.BlockSpec((t, LANE), in_map),
            ],
            out_specs=pl.BlockSpec((None, SUBLANE, LANE), lambda p, i: (p, 0, 0)),
        ),
        compiler_params=pltpu.CompilerParams(
            dimension_semantics=("parallel", "arbitrary"),
            vmem_limit_bytes=vmem_limit),
    )(img, rec)

    # Single tiny cross-lane reduction outside the hot loop.
    return jnp.sum(parts)


def _kl_sum(post_mean, post_logvar, tile_rows, vmem_limit):
    """sum 0.5*(mean^2 + exp(logvar) - 1 - logvar) over all latent elements (f32)."""
    mean, rows = _to_slab(post_mean)
    lvar, _ = _to_slab(post_logvar)

    t = _pick_tile(rows, tile_rows)
    blocks = _cdiv(rows, t)
    needs_mask = (blocks * t != rows)

    part = pl.pallas_call(
        _make_kl_kernel(t, rows, needs_mask),
        out_shape=jax.ShapeDtypeStruct((SUBLANE, LANE), jnp.float32),
        grid_spec=pltpu.PrefetchScalarGridSpec(
            num_scalar_prefetch=0,
            grid=(blocks,),
            in_specs=[
                pl.BlockSpec((t, LANE), lambda i: (i, 0)),
                pl.BlockSpec((t, LANE), lambda i: (i, 0)),
            ],
            out_specs=pl.BlockSpec((SUBLANE, LANE), lambda i: (0, 0)),
        ),
        compiler_params=pltpu.CompilerParams(
            dimension_semantics=("arbitrary",),
            vmem_limit_bytes=vmem_limit),
    )(mean, lvar)

    return jnp.sum(part)


# ------------------------------ public API ----------------------------------- #

def autoencoder_loss(images, z, reconstructions, post_mean, post_logvar,
                     log_var, kl_weight=1e-6, tile_rows=None, n_parallel=None):
    """Pallas implementation of AutoencoderLoss.forward (htr=None, writer_id=None)."""
    del z  # only used by the (untranslated) htr / writer_id branches

    d_tile, d_par, vmem_limit = _chip_defaults()
    tile_rows = d_tile if tile_rows is None else tile_rows
    n_parallel = d_par if n_parallel is None else n_parallel

    rec_sum = _abs_diff_sum(images, reconstructions, tile_rows, n_parallel, vmem_limit)
    kl_sum = _kl_sum(post_mean, post_logvar, tile_rows, vmem_limit)

    n_img = images.size
    batch = images.shape[0]
    lv = jnp.asarray(log_var, jnp.float32)

    rec_loss_mean = rec_sum / n_img
    # Exact identity: mean(|d| / exp(lv) + lv) == mean(|d|) * exp(-lv) + lv.
    # NOTE: only valid because log_var is a scalar parameter (as in the module).
    nll_loss = rec_loss_mean * jnp.exp(-lv) + lv
    kl_loss = kl_sum / batch               # per-sample KL sum, averaged over batch
    loss = nll_loss + kl_weight * kl_loss

    losses = {"loss": loss,
              "htr_loss": jnp.float32(0.0),
              "writer_loss": jnp.float32(0.0)}
    log = {"train/total_loss": loss,
           "train/log_var": lv,
           "train/kl_loss": kl_loss,
           "train/nll_loss": nll_loss,
           "train/rec_loss": rec_loss_mean,
           "train/writer_loss": jnp.float32(0.0),
           "train/HTR_loss": jnp.float32(0.0)}
    return losses, log


# ------------------------------ reference & main ----------------------------- #

def _reference_loss(images, reconstructions, post_mean, post_logvar, log_var,
                    kl_weight=1e-6):
    rec = jnp.abs(images - reconstructions)
    nll = (rec / jnp.exp(log_var) + log_var).mean()
    kl = 0.5 * jnp.sum(post_mean ** 2 + jnp.exp(post_logvar) - 1.0 - post_logvar,
                       axis=(1, 2, 3)).mean()
    return nll + kl_weight * kl


if __name__ == "__main__":
    key = jax.random.PRNGKey(0)
    k1, k2, k3, k4, k5 = jax.random.split(key, 5)

    B, C, H, W = 2, 4, 16, 16          # images / reconstructions
    Cz, Hz, Wz = 4, 8, 8               # posterior latents

    images = jax.random.normal(k1, (B, C, H, W), dtype=jnp.float32)
    reconstructions = jax.random.normal(k2, (B, C, H, W), dtype=jnp.float32)
    z = jax.random.normal(k3, (B, Cz, Hz, Wz), dtype=jnp.float32)
    post_mean = 0.1 * jax.random.normal(k4, (B, Cz, Hz, Wz), dtype=jnp.float32)
    post_logvar = 0.1 * jax.random.normal(k5, (B, Cz, Hz, Wz), dtype=jnp.float32)

    log_var = jnp.float32(0.0)         # nn.Parameter(ones(()) * logvar_init=0.0)
    kl_weight = 1e-6

    losses, log = autoencoder_loss(images, z, reconstructions,
                                   post_mean, post_logvar, log_var,
                                   kl_weight=kl_weight)
    loss = jax.block_until_ready(losses["loss"])

    ref = _reference_loss(images, reconstructions, post_mean, post_logvar,
                          log_var, kl_weight)
    assert jnp.allclose(loss, ref, rtol=1e-5, atol=1e-5), (loss, ref)
    print("KERNEL_OK")
</pallas_src>

<mosaic_0001>
module attributes {stable_mosaic.version = 11 : i64} {
  func.func @kernel(%arg0: i32, %arg1: i32, %arg2: memref<16x128xf32, #tpu.memory_space<vmem>>, %arg3: memref<16x128xf32, #tpu.memory_space<vmem>>, %arg4: memref<1x8x128xf32, #tpu.memory_space<vmem>>) attributes {dimension_semantics = [#tpu.dimension_semantics<parallel>, #tpu.dimension_semantics<arbitrary>], iteration_bounds = array<i64: 1, 1>, scalar_prefetch = 0 : i64, scratch_operands = 0 : i64, tpu.core_type = #tpu.core_type<tc>, window_params = [{transform_indices = @transform_0, window_bounds = array<i64: 16, 128>}, {transform_indices = @transform_1, window_bounds = array<i64: 16, 128>}, {transform_indices = @transform_2, window_bounds = array<i64: 1, 8, 128>}]} {
    %c0_i32 = arith.constant 0 : i32
    %0 = arith.cmpi eq, %arg1, %c0_i32 : i32
    %1 = arith.extui %0 : i1 to i32
    %c0_i32_0 = arith.constant 0 : i32
    %2 = arith.cmpi ne, %1, %c0_i32_0 : i32
    scf.if %2 {
      %cst_10 = arith.constant 0.000000e+00 : f32
      %15 = vector.broadcast %cst_10 : f32 to vector<8x128xf32>
      %c0_11 = arith.constant 0 : index
      %c0_12 = arith.constant 0 : index
      %c0_13 = arith.constant 0 : index
      %16 = vector.load %arg4[%c0_11, %c0_12, %c0_13] : memref<1x8x128xf32, #tpu.memory_space<vmem>>, vector<1x8x128xf32>
      %17 = vector.shape_cast %16 : vector<1x8x128xf32> to vector<8x128xf32>
      %18 = vector.shape_cast %15 : vector<8x128xf32> to vector<1x8x128xf32>
      tpu.vector_store %arg4[%c0_11, %c0_12, %c0_13], %18 {strides = array<i32>} : memref<1x8x128xf32, #tpu.memory_space<vmem>>, vector<1x8x128xf32>,
    } else {
    }
    %c0 = arith.constant 0 : index
    %c0_1 = arith.constant 0 : index
    %3 = vector.load %arg2[%c0, %c0_1] : memref<16x128xf32, #tpu.memory_space<vmem>>, vector<16x128xf32>
    %c0_2 = arith.constant 0 : index
    %c0_3 = arith.constant 0 : index
    %4 = vector.load %arg3[%c0_2, %c0_3] : memref<16x128xf32, #tpu.memory_space<vmem>>, vector<16x128xf32>
    %5 = arith.subf %3, %4 : vector<16x128xf32>
    %6 = math.absf %5 : vector<16x128xf32>
    %c0_4 = arith.constant 0 : index
    %c0_5 = arith.constant 0 : index
    %c0_6 = arith.constant 0 : index
    %7 = vector.load %arg4[%c0_4, %c0_5, %c0_6] : memref<1x8x128xf32, #tpu.memory_space<vmem>>, vector<1x8x128xf32>
    %8 = vector.shape_cast %7 : vector<1x8x128xf32> to vector<8x128xf32>
    %9 = vector.shape_cast %6 : vector<16x128xf32> to vector<2x8x128xf32>
    %cst = arith.constant dense<0.000000e+00> : vector<8x128xf32>
    %10 = vector.multi_reduction <add>, %9, %cst [0] : vector<2x8x128xf32> to vector<8x128xf32>
    %11 = arith.addf %8, %10 : vector<8x128xf32>
    %c0_7 = arith.constant 0 : index
    %c0_8 = arith.constant 0 : index
    %c0_9 = arith.constant 0 : index
    %12 = vector.load %arg4[%c0_7, %c0_8, %c0_9] : memref<1x8x128xf32, #tpu.memory_space<vmem>>, vector<1x8x128xf32>
    %13 = vector.shape_cast %12 : vector<1x8x128xf32> to vector<8x128xf32>
    %14 = vector.shape_cast %11 : vector<8x128xf32> to vector<1x8x128xf32>
    tpu.vector_store %arg4[%c0_7, %c0_8, %c0_9], %14 {strides = array<i32>} : memref<1x8x128xf32, #tpu.memory_space<vmem>>, vector<1x8x128xf32>,
    return
  }
  func.func @transform_0(%arg0: i32, %arg1: i32) -> (i32, i32) {
    %c1_i32 = arith.constant 1 : i32
    %0 = arith.muli %arg0, %c1_i32 : i32
    %1 = arith.addi %0, %arg1 : i32
    %c0_i32 = arith.constant 0 : i32
    %2 = arith.minsi %1, %c0_i32 : i32
    %c0_i32_0 = arith.constant 0 : i32
    %c0_i32_1 = arith.constant 0 : i32
    return %2, %c0_i32_0 : i32, i32
  }
  func.func @transform_1(%arg0: i32, %arg1: i32) -> (i32, i32) {
    %c1_i32 = arith.constant 1 : i32
    %0 = arith.muli %arg0, %c1_i32 : i32
    %1 = arith.addi %0, %arg1 : i32
    %c0_i32 = arith.constant 0 : i32
    %2 = arith.minsi %1, %c0_i32 : i32
    %c0_i32_0 = arith.constant 0 : i32
    %c0_i32_1 = arith.constant 0 : i32
    return %2, %c0_i32_0 : i32, i32
  }
  func.func @transform_2(%arg0: i32, %arg1: i32) -> (i32, i32, i32) {
    %c0_i32 = arith.constant 0 : i32
    %c0_i32_0 = arith.constant 0 : i32
    %c0_i32_1 = arith.constant 0 : i32
    return %arg0, %c0_i32, %c0_i32_0 : i32, i32, i32
  }
}

</mosaic_0001>

<bundles_post_ra>
// kernel: tpu_custom_call.1
= control target key start
LH: loop header
LB: loop body
LE: loop exit
PB: predicated region body
PF: predicated region fallthrough
CT: control target
= control target key end

     0   :  { %7 = vsyncpa [#allocation3], 0  ;;  %s216_s0 = inlined_call_operand.hbm [shape: f32[16,128], index: 0, kind: input, shape index: {}]   ;;  %s217_s1 = inlined_call_operand.hbm [shape: f32[16,128], index: 1, kind: input, shape index: {}]   ;;  %s218_s2 = inlined_call_operand.hbm [shape: f32[1,8,128], index: 2, kind: output, shape index: {}]  }
   0x1   :  { %8 = vsyncpa [#allocation6], 0 }
   0x2   :  { %9 = vsyncpa [#allocation4], 0  ;;  %s20_s11 = sshll.u32 %s216_s0, 4  ;;  %s187_s12 = smov [#allocation2]   ;;  %s21_s11 = int_to_ptr.hbm [resolvable:$true] %s20_s11 }
   0x3   :  { %s22_s13 = sshll.u32 %s187_s12, 4  ;;  %s39_s16 = sshll.u32 %s217_s1, 4  ;;  %s23_s13 = int_to_ptr.vmem [resolvable:$true] %s22_s13  ;;  %s40_s16 = int_to_ptr.hbm [resolvable:$true] %s39_s16 }
   0x4   :  { %s188_s17 = smov 128   ;;  %s189_s18 = smov 8  }
   0x5   :  { %28 = dma.hbm_to_vmem [thread:$0]  %s21_s11, 256, %s23_s13, [#allocation3], %s188_s17, %s188_s17, %s189_s18  }
   0x6   :  { %s190_s19 = smov [#allocation5]  }
   0x7   :  { %s41_s20 = sshll.u32 %s190_s19, 4  ;;  %s42_s20 = int_to_ptr.vmem [resolvable:$true] %s41_s20 }
   0x8   :  { %47 = dma.hbm_to_vmem [thread:$0]  %s40_s16, 256, %s42_s20, [#allocation6], %s188_s17, %s188_s17, %s189_s18  }
   0x9   :  { %181 = dma.done.wait [#allocation3], 256  }
   0xa   :  { %182 = vsyncadd [#allocation3], 4294967040 }
   0xb   :  { %183 = dma.done.wait [#allocation6], 256  }
   0xc   :  { %184 = vsyncadd [#allocation6], 4294967040  ;;  %v69_v0 = vld [vmem:[#allocation2] sm:$0xff]  ;;  %v70_v1 = vld [vmem:[#allocation2 + $0x8] sm:$0xff]  ;;  %s191_s0 = smov [#allocation7]   ;;  %s88_s23 = sshll.u32 %s218_s2, 4  ;;  %s89_s23 = int_to_ptr.hbm [resolvable:$true] %s88_s23 }
   0xd   :  { %v71_v2 = vld [vmem:[#allocation5] sm:$0xff]  ;;  %v72_v3 = vld [vmem:[#allocation5 + $0x8] sm:$0xff]  ;;  %s86_s1 = sshll.u32 %s191_s0, 4  ;;  %s87_s1 = int_to_ptr.vmem [resolvable:$true] %s86_s1 }
   0xe   :  { %v73_v4 = vsub.f32 %v69_v0, %v71_v2  ;;  %v74_v5 = vsub.f32 %v70_v1, %v72_v3 }
  0x10   :  { %v75_v6 = vand.u32 2147483647, %v73_v4  ;;  %v76_v7 = vand.u32 2147483647, %v74_v5 }
  0x12   :  { %v78_v8 = vadd.f32 %v76_v7, %v75_v6 }
  0x14   :  { %80 = vst [vmem:[#allocation7] sm:$0xff] %v78_v8 }
  0x15   :  { %91 = dma.vmem_to_hbm [thread:$0]  %s87_s1, 128, %s89_s23, [#allocation4]  }
  0x16   :  { %185 = dma.done.wait [#allocation4], 128  }
  0x17   :  { %186 = vsyncadd [#allocation4], 4294967168 }
  0x18   :  { %96 = vsyncpa [#allocation3], 1 }
  0x19   :  { %97 = vsyncpa [#allocation6], 1 }
  0x1a   :  { %98 = vsyncpa [#allocation4], 1 }

</bundles_post_ra>
